<compile_context>
chip_gen: v7x
topology: tpu7x:2x2x1
jax: 0.10.0
libtpu: 0.0.40
codegen_flags: <defaults>
</compile_context>

<pallas_src>
import functools

import jax
import jax.numpy as jnp
from jax.experimental import pallas as pl
from jax.experimental.pallas import tpu as pltpu


def _round_up(x, m):
    return (x + m - 1) // m * m


def _cdiv(a, b):
    return -(-a // b)


def _default_mxu_align():
    """256 on v6e/v7x (2x256x256 MXU), 128 on v5e and unknown chips."""
    try:
        kind = jax.devices()[0].device_kind.lower()
        if "v6" in kind or "v7" in kind:
            return 256
    except Exception:
        pass
    return 128


def _pad_dim(d, mxu_align):
    # Lane dims must be multiples of 128; use the wider MXU alignment only
    # when the true dim already exceeds 128 (avoid over-padding tiny layers).
    if d <= 128:
        return 128
    return _round_up(d, mxu_align)


def _mlp_fused_kernel(*refs, num_layers, activation, gelu_approximate):
    """Fused MLP on one (tm, Kpad0) row tile.

    refs layout: x_ref, (w_ref_0, b_ref_0), ..., (w_ref_{L-1}, b_ref_{L-1}), o_ref

    x_ref : (tm, Kpad0)        bf16  zero-padded input rows
    w_ref : (Kpad_l, Npad_l)   bf16  zero-padded weights (in, out)
    b_ref : (1, Npad_l)        f32   zero-padded biases
    o_ref : (tm, Npad_last)    f32   zero-padded output rows

    Padded lanes stay exactly zero through every layer: padded weight
    rows/cols and padded biases are zero and act(0) == 0 for relu/gelu/lrelu,
    so padding never contaminates real output lanes.
    """
    x_ref = refs[0]
    o_ref = refs[1 + 2 * num_layers]

    h = x_ref[...]  # bf16 MXU LHS for the first layer
    for l in range(num_layers):  # small static L -> unrolled
        w_ref = refs[1 + 2 * l]
        b_ref = refs[2 + 2 * l]
        # MXU in bf16 (native on v6e/v7x), accumulate in f32.
        y = jnp.dot(h, w_ref[...], preferred_element_type=jnp.float32)
        y = y + b_ref[...]  # (1, Npad_l) broadcast over rows; f32 epilogue
        if activation == "relu":
            a = jnp.maximum(y, 0.0)
        elif activation == "gelu":
            # nn.GELU() default is the exact erf GELU (gelu_approximate=False
            # keeps parity; True moves the work to the EUP slot).
            a = jax.nn.gelu(y, approximate=gelu_approximate)
        elif activation == "lrelu":
            # nn.LeakyReLU() default negative_slope = 0.01
            a = jnp.where(y > 0, y, 0.01 * y)
        else:
            raise ValueError(f"unknown activation: {activation}")
        # Dropout: identity in eval mode.
        # TODO(synk): train-mode dropout needs pltpu.prng_seed/prng_random_bits.
        if l + 1 < num_layers:
            h = a.astype(jnp.bfloat16)  # bf16 carry halves live VMEM/vreg bytes
        else:
            o_ref[...] = a.astype(o_ref.dtype)


def init_mlp_params(key, chan_in, chan_out):
    """Parameter init mimicking weights_init_normal (W ~ N(0, 0.02), b = 0)."""
    params = []
    in_c = chan_in
    for out_c in chan_out:
        key, kw, kb = jax.random.split(key, 3)
        w = 0.02 * jax.random.normal(kw, (in_c, out_c), dtype=jnp.float32)
        b = jnp.zeros((out_c,), dtype=jnp.float32)
        params.append((w, b))
        in_c = out_c
    return params


def pack_params(params, chan_in, chan_out, mxu_align=None):
    """Zero-pad each layer's feature dims independently (to 128, or 256 on
    v6e/v7x for dims > 128). Weights stored bf16, biases f32."""
    if mxu_align is None:
        mxu_align = _default_mxu_align()
    dims = [chan_in] + list(chan_out)
    dims_pad = [_pad_dim(d, mxu_align) for d in dims]
    w_list, b_list = [], []
    for l, (w, b) in enumerate(params):
        kp, np_ = dims_pad[l], dims_pad[l + 1]
        k, n = w.shape
        wp = jnp.zeros((kp, np_), dtype=jnp.bfloat16)
        wp = wp.at[:k, :n].set(w.astype(jnp.bfloat16))
        bp = jnp.zeros((1, np_), dtype=jnp.float32).at[0, :n].set(b)
        w_list.append(wp)
        b_list.append(bp)
    return w_list, b_list, dims_pad


def mlp_forward(x, w_list, b_list, chan_out, activation="relu",
                gelu_approximate=False, tm_max=1024):
    """MLP.forward: fused sequential DenseBlocks in a single pallas_call."""
    M, K = x.shape
    L = len(w_list)
    n_out = chan_out[-1]
    Kpad0 = w_list[0].shape[0]
    Npads = [w.shape[1] for w in w_list]
    Npad_last = Npads[-1]

    weight_bytes = sum(int(w.size) * 2 for w in w_list)   # bf16
    bias_bytes = sum(int(b.size) * 4 for b in b_list)      # f32

    # ---- explicit VMEM budget (v7x: 64 MiB/TC; v5e/v6e: 128 MiB) ----------
    try:
        hw_vmem = int(pltpu.get_tpu_info().vmem_capacity_bytes)
    except Exception:
        hw_vmem = 64 * 1024 * 1024  # conservative (v7x per-TC)
    budget = min(hw_vmem - (8 << 20), 96 << 20)

    # Per-row VMEM: double-buffered bf16 x tile + double-buffered f32 out tile
    # + live f32 accumulator + bf16 carry at the widest layer.
    max_pad = max([Kpad0] + Npads)
    per_row = 2 * Kpad0 * 2 + 2 * Npad_last * 4 + max_pad * 4 + max_pad * 2
    avail = budget - weight_bytes - bias_bytes - (2 << 20)  # 2 MiB slack
    tm_cap = max(8, min(tm_max, avail // per_row) // 8 * 8)

    # ---- balanced M tiling -------------------------------------------------
    num_tiles = _cdiv(M, tm_cap)
    tm = min(tm_cap, _round_up(_cdiv(M, num_tiles), 8))
    m_pad = tm * num_tiles

    # Pad + cast input in one pass; bf16 DMA (it is the MXU's LHS format).
    x_pad = jnp.zeros((m_pad, Kpad0), dtype=jnp.bfloat16)
    x_pad = x_pad.at[:M, :K].set(x.astype(jnp.bfloat16))

    # ---- cost estimate: padded work, dtypes actually DMA'd ----------------
    dims_pad = [Kpad0] + Npads
    flops = sum(2 * m_pad * dims_pad[i] * dims_pad[i + 1] for i in range(L))
    transcendentals = m_pad * sum(Npads) if activation == "gelu" else 0
    bytes_accessed = (int(x_pad.size) * 2 + weight_bytes + bias_bytes
                      + m_pad * Npad_last * 4)

    kernel = functools.partial(_mlp_fused_kernel, num_layers=L,
                               activation=activation,
                               gelu_approximate=gelu_approximate)

    wb_operands = []
    for l in range(L):
        wb_operands += [w_list[l], b_list[l]]

    def _call(single_buffer_weights):
        in_specs = [pl.BlockSpec((tm, Kpad0), lambda i: (i, 0))]  # x rows: tiled
        for l in range(L):
            kp, np_ = w_list[l].shape
            if single_buffer_weights:
                # Block index is constant across the grid -> one VMEM copy.
                w_spec = pl.BlockSpec((kp, np_), lambda i: (0, 0),
                                      pipeline_mode=pl.Buffered(1))
                b_spec = pl.BlockSpec((1, np_), lambda i: (0, 0),
                                      pipeline_mode=pl.Buffered(1))
            else:
                w_spec = pl.BlockSpec((kp, np_), lambda i: (0, 0))
                b_spec = pl.BlockSpec((1, np_), lambda i: (0, 0))
            in_specs += [w_spec, b_spec]

        return pl.pallas_call(
            kernel,
            out_shape=jax.ShapeDtypeStruct((m_pad, Npad_last), jnp.float32),
            grid_spec=pltpu.PrefetchScalarGridSpec(
                num_scalar_prefetch=0,
                grid=(m_pad // tm,),
                in_specs=in_specs,
                out_specs=pl.BlockSpec((tm, Npad_last), lambda i: (i, 0)),
            ),
            compiler_params=pltpu.CompilerParams(
                dimension_semantics=("parallel",),
                vmem_limit_bytes=int(budget)),
            cost_estimate=pl.CostEstimate(
                flops=int(flops),
                transcendentals=int(transcendentals),
                bytes_accessed=int(bytes_accessed)),
        )(x_pad, *wb_operands)

    try:
        out = _call(True)
    except Exception:
        # Buffered(1) unsupported by this JAX build -> default double buffering.
        out = _call(False)

    return out[:M, :n_out]


if __name__ == "__main__":
    key = jax.random.PRNGKey(0)
    k_x, k_p = jax.random.split(key)

    batch = 8
    chan_in = 32
    chan_out = [64, 32, 16]

    x = jax.random.normal(k_x, (batch, chan_in), dtype=jnp.float32)
    params = init_mlp_params(k_p, chan_in, chan_out)
    w_list, b_list, dims_pad = pack_params(params, chan_in, chan_out)

    out = mlp_forward(x, w_list, b_list, chan_out, activation="relu")
    out = jax.block_until_ready(out)

    # Pure-JAX f32 reference (bf16 MXU inputs -> loose tolerance).
    ref = x
    for (w, b) in params:
        ref = jnp.maximum(ref @ w + b, 0.0)

    assert out.shape == (batch, chan_out[-1]), out.shape
    assert out.dtype == jnp.float32
    assert bool(jnp.all(jnp.isfinite(out)))
    assert bool(jnp.all(out >= 0.0))  # ReLU output must be non-negative.
    assert bool(jnp.max(jnp.abs(out - ref)) < 5e-2), float(
        jnp.max(jnp.abs(out - ref)))

    print("KERNEL_OK")
</pallas_src>

<mosaic_0001>
module attributes {stable_mosaic.version = 11 : i64} {
  func.func @_mlp_fused_kernel(%arg0: i32, %arg1: memref<8x128xbf16, #tpu.memory_space<vmem>>, %arg2: memref<128x128xbf16, #tpu.memory_space<vmem>>, %arg3: memref<1x128xf32, #tpu.memory_space<vmem>>, %arg4: memref<128x128xbf16, #tpu.memory_space<vmem>>, %arg5: memref<1x128xf32, #tpu.memory_space<vmem>>, %arg6: memref<128x128xbf16, #tpu.memory_space<vmem>>, %arg7: memref<1x128xf32, #tpu.memory_space<vmem>>, %arg8: memref<8x128xf32, #tpu.memory_space<vmem>>) attributes {dimension_semantics = [#tpu.dimension_semantics<parallel>], iteration_bounds = array<i64: 1>, scalar_prefetch = 0 : i64, scratch_operands = 0 : i64, tpu.core_type = #tpu.core_type<tc>, window_params = [{transform_indices = @transform_0, window_bounds = array<i64: 8, 128>}, {pipeline_mode = #tpu.pipeline_mode<synchronous>, transform_indices = @transform_1, window_bounds = array<i64: 128, 128>}, {pipeline_mode = #tpu.pipeline_mode<synchronous>, transform_indices = @transform_2, window_bounds = array<i64: 1, 128>}, {pipeline_mode = #tpu.pipeline_mode<synchronous>, transform_indices = @transform_3, window_bounds = array<i64: 128, 128>}, {pipeline_mode = #tpu.pipeline_mode<synchronous>, transform_indices = @transform_4, window_bounds = array<i64: 1, 128>}, {pipeline_mode = #tpu.pipeline_mode<synchronous>, transform_indices = @transform_5, window_bounds = array<i64: 128, 128>}, {pipeline_mode = #tpu.pipeline_mode<synchronous>, transform_indices = @transform_6, window_bounds = array<i64: 1, 128>}, {transform_indices = @transform_7, window_bounds = array<i64: 8, 128>}]} {
    %c0 = arith.constant 0 : index
    %c0_0 = arith.constant 0 : index
    %0 = vector.load %arg1[%c0, %c0_0] : memref<8x128xbf16, #tpu.memory_space<vmem>>, vector<8x128xbf16>
    %c0_1 = arith.constant 0 : index
    %c0_2 = arith.constant 0 : index
    %1 = vector.load %arg2[%c0_1, %c0_2] : memref<128x128xbf16, #tpu.memory_space<vmem>>, vector<128x128xbf16>
    %cst = arith.constant dense<0.000000e+00> : vector<8x128xf32>
    %2 = tpu.matmul %0, %1, %cst {dimension_numbers = #tpu.dot_dimension_numbers<[1], [0], [0], [1], [0, 0, 1, 1], [], []>} : vector<8x128xbf16>, vector<128x128xbf16>, vector<8x128xf32> -> vector<8x128xf32>
    %c0_3 = arith.constant 0 : index
    %c0_4 = arith.constant 0 : index
    %3 = vector.load %arg3[%c0_3, %c0_4] : memref<1x128xf32, #tpu.memory_space<vmem>>, vector<1x128xf32>
    %4 = vector.broadcast %3 : vector<1x128xf32> to vector<8x128xf32>
    %5 = arith.addf %2, %4 : vector<8x128xf32>
    %cst_5 = arith.constant 0.000000e+00 : f32
    %6 = vector.broadcast %cst_5 : f32 to vector<8x128xf32>
    %7 = arith.maximumf %5, %6 : vector<8x128xf32>
    %8 = arith.truncf %7 : vector<8x128xf32> to vector<8x128xbf16>
    %c0_6 = arith.constant 0 : index
    %c0_7 = arith.constant 0 : index
    %9 = vector.load %arg4[%c0_6, %c0_7] : memref<128x128xbf16, #tpu.memory_space<vmem>>, vector<128x128xbf16>
    %cst_8 = arith.constant dense<0.000000e+00> : vector<8x128xf32>
    %10 = tpu.matmul %8, %9, %cst_8 {dimension_numbers = #tpu.dot_dimension_numbers<[1], [0], [0], [1], [0, 0, 1, 1], [], []>} : vector<8x128xbf16>, vector<128x128xbf16>, vector<8x128xf32> -> vector<8x128xf32>
    %c0_9 = arith.constant 0 : index
    %c0_10 = arith.constant 0 : index
    %11 = vector.load %arg5[%c0_9, %c0_10] : memref<1x128xf32, #tpu.memory_space<vmem>>, vector<1x128xf32>
    %12 = vector.broadcast %11 : vector<1x128xf32> to vector<8x128xf32>
    %13 = arith.addf %10, %12 : vector<8x128xf32>
    %cst_11 = arith.constant 0.000000e+00 : f32
    %14 = vector.broadcast %cst_11 : f32 to vector<8x128xf32>
    %15 = arith.maximumf %13, %14 : vector<8x128xf32>
    %16 = arith.truncf %15 : vector<8x128xf32> to vector<8x128xbf16>
    %c0_12 = arith.constant 0 : index
    %c0_13 = arith.constant 0 : index
    %17 = vector.load %arg6[%c0_12, %c0_13] : memref<128x128xbf16, #tpu.memory_space<vmem>>, vector<128x128xbf16>
    %cst_14 = arith.constant dense<0.000000e+00> : vector<8x128xf32>
    %18 = tpu.matmul %16, %17, %cst_14 {dimension_numbers = #tpu.dot_dimension_numbers<[1], [0], [0], [1], [0, 0, 1, 1], [], []>} : vector<8x128xbf16>, vector<128x128xbf16>, vector<8x128xf32> -> vector<8x128xf32>
    %c0_15 = arith.constant 0 : index
    %c0_16 = arith.constant 0 : index
    %19 = vector.load %arg7[%c0_15, %c0_16] : memref<1x128xf32, #tpu.memory_space<vmem>>, vector<1x128xf32>
    %20 = vector.broadcast %19 : vector<1x128xf32> to vector<8x128xf32>
    %21 = arith.addf %18, %20 : vector<8x128xf32>
    %cst_17 = arith.constant 0.000000e+00 : f32
    %22 = vector.broadcast %cst_17 : f32 to vector<8x128xf32>
    %23 = arith.maximumf %21, %22 : vector<8x128xf32>
    %c0_18 = arith.constant 0 : index
    %c0_19 = arith.constant 0 : index
    %24 = vector.load %arg8[%c0_18, %c0_19] : memref<8x128xf32, #tpu.memory_space<vmem>>, vector<8x128xf32>
    tpu.vector_store %arg8[%c0_18, %c0_19], %23 {strides = array<i32>} : memref<8x128xf32, #tpu.memory_space<vmem>>, vector<8x128xf32>,
    return
  }
  func.func @transform_0(%arg0: i32) -> (i32, i32) {
    %c0_i32 = arith.constant 0 : i32
    %c0_i32_0 = arith.constant 0 : i32
    return %arg0, %c0_i32 : i32, i32
  }
  func.func @transform_1(%arg0: i32) -> (i32, i32) {
    %c0_i32 = arith.constant 0 : i32
    %c0_i32_0 = arith.constant 0 : i32
    %c0_i32_1 = arith.constant 0 : i32
    return %c0_i32, %c0_i32_0 : i32, i32
  }
  func.func @transform_2(%arg0: i32) -> (i32, i32) {
    %c0_i32 = arith.constant 0 : i32
    %c0_i32_0 = arith.constant 0 : i32
    %c0_i32_1 = arith.constant 0 : i32
    return %c0_i32, %c0_i32_0 : i32, i32
  }
  func.func @transform_3(%arg0: i32) -> (i32, i32) {
    %c0_i32 = arith.constant 0 : i32
    %c0_i32_0 = arith.constant 0 : i32
    %c0_i32_1 = arith.constant 0 : i32
    return %c0_i32, %c0_i32_0 : i32, i32
  }
  func.func @transform_4(%arg0: i32) -> (i32, i32) {
    %c0_i32 = arith.constant 0 : i32
    %c0_i32_0 = arith.constant 0 : i32
    %c0_i32_1 = arith.constant 0 : i32
    return %c0_i32, %c0_i32_0 : i32, i32
  }
  func.func @transform_5(%arg0: i32) -> (i32, i32) {
    %c0_i32 = arith.constant 0 : i32
    %c0_i32_0 = arith.constant 0 : i32
    %c0_i32_1 = arith.constant 0 : i32
    return %c0_i32, %c0_i32_0 : i32, i32
  }
  func.func @transform_6(%arg0: i32) -> (i32, i32) {
    %c0_i32 = arith.constant 0 : i32
    %c0_i32_0 = arith.constant 0 : i32
    %c0_i32_1 = arith.constant 0 : i32
    return %c0_i32, %c0_i32_0 : i32, i32
  }
  func.func @transform_7(%arg0: i32) -> (i32, i32) {
    %c0_i32 = arith.constant 0 : i32
    %c0_i32_0 = arith.constant 0 : i32
    return %arg0, %c0_i32 : i32, i32
  }
}

module attributes {stable_mosaic.version = 11 : i64} {
  func.func @_mlp_fused_kernel(%arg0: i32, %arg1: memref<8x128xbf16, #tpu.memory_space<vmem>>, %arg2: memref<128x128xbf16, #tpu.memory_space<vmem>>, %arg3: memref<1x128xf32, #tpu.memory_space<vmem>>, %arg4: memref<128x128xbf16, #tpu.memory_space<vmem>>, %arg5: memref<1x128xf32, #tpu.memory_space<vmem>>, %arg6: memref<128x128xbf16, #tpu.memory_space<vmem>>, %arg7: memref<1x128xf32, #tpu.memory_space<vmem>>, %arg8: memref<8x128xf32, #tpu.memory_space<vmem>>) attributes {dimension_semantics = [#tpu.dimension_semantics<parallel>], iteration_bounds = array<i64: 1>, scalar_prefetch = 0 : i64, scratch_operands = 0 : i64, tpu.core_type = #tpu.core_type<tc>, window_params = [{transform_indices = @transform_0, window_bounds = array<i64: 8, 128>}, {pipeline_mode = #tpu.pipeline_mode<synchronous>, transform_indices = @transform_1, window_bounds = array<i64: 128, 128>}, {pipeline_mode = #tpu.pipeline_mode<synchronous>, transform_indices = @transform_2, window_bounds = array<i64: 1, 128>}, {pipeline_mode = #tpu.pipeline_mode<synchronous>, transform_indices = @transform_3, window_bounds = array<i64: 128, 128>}, {pipeline_mode = #tpu.pipeline_mode<synchronous>, transform_indices = @transform_4, window_bounds = array<i64: 1, 128>}, {pipeline_mode = #tpu.pipeline_mode<synchronous>, transform_indices = @transform_5, window_bounds = array<i64: 128, 128>}, {pipeline_mode = #tpu.pipeline_mode<synchronous>, transform_indices = @transform_6, window_bounds = array<i64: 1, 128>}, {transform_indices = @transform_7, window_bounds = array<i64: 8, 128>}]} {
    %c0 = arith.constant 0 : index
    %c0_0 = arith.constant 0 : index
    %0 = vector.load %arg1[%c0, %c0_0] : memref<8x128xbf16, #tpu.memory_space<vmem>>, vector<8x128xbf16>
    %c0_1 = arith.constant 0 : index
    %c0_2 = arith.constant 0 : index
    %1 = vector.load %arg2[%c0_1, %c0_2] : memref<128x128xbf16, #tpu.memory_space<vmem>>, vector<128x128xbf16>
    %cst = arith.constant dense<0.000000e+00> : vector<8x128xf32>
    %2 = tpu.matmul %0, %1, %cst {dimension_numbers = #tpu.dot_dimension_numbers<[1], [0], [0], [1], [0, 0, 1, 1], [], []>} : vector<8x128xbf16>, vector<128x128xbf16>, vector<8x128xf32> -> vector<8x128xf32>
    %c0_3 = arith.constant 0 : index
    %c0_4 = arith.constant 0 : index
    %3 = vector.load %arg3[%c0_3, %c0_4] : memref<1x128xf32, #tpu.memory_space<vmem>>, vector<1x128xf32>
    %4 = vector.broadcast %3 : vector<1x128xf32> to vector<8x128xf32>
    %5 = arith.addf %2, %4 : vector<8x128xf32>
    %cst_5 = arith.constant 0.000000e+00 : f32
    %6 = vector.broadcast %cst_5 : f32 to vector<8x128xf32>
    %7 = arith.maximumf %5, %6 : vector<8x128xf32>
    %8 = arith.truncf %7 : vector<8x128xf32> to vector<8x128xbf16>
    %c0_6 = arith.constant 0 : index
    %c0_7 = arith.constant 0 : index
    %9 = vector.load %arg4[%c0_6, %c0_7] : memref<128x128xbf16, #tpu.memory_space<vmem>>, vector<128x128xbf16>
    %cst_8 = arith.constant dense<0.000000e+00> : vector<8x128xf32>
    %10 = tpu.matmul %8, %9, %cst_8 {dimension_numbers = #tpu.dot_dimension_numbers<[1], [0], [0], [1], [0, 0, 1, 1], [], []>} : vector<8x128xbf16>, vector<128x128xbf16>, vector<8x128xf32> -> vector<8x128xf32>
    %c0_9 = arith.constant 0 : index
    %c0_10 = arith.constant 0 : index
    %11 = vector.load %arg5[%c0_9, %c0_10] : memref<1x128xf32, #tpu.memory_space<vmem>>, vector<1x128xf32>
    %12 = vector.broadcast %11 : vector<1x128xf32> to vector<8x128xf32>
    %13 = arith.addf %10, %12 : vector<8x128xf32>
    %cst_11 = arith.constant 0.000000e+00 : f32
    %14 = vector.broadcast %cst_11 : f32 to vector<8x128xf32>
    %15 = arith.maximumf %13, %14 : vector<8x128xf32>
    %16 = arith.truncf %15 : vector<8x128xf32> to vector<8x128xbf16>
    %c0_12 = arith.constant 0 : index
    %c0_13 = arith.constant 0 : index
    %17 = vector.load %arg6[%c0_12, %c0_13] : memref<128x128xbf16, #tpu.memory_space<vmem>>, vector<128x128xbf16>
    %cst_14 = arith.constant dense<0.000000e+00> : vector<8x128xf32>
    %18 = tpu.matmul %16, %17, %cst_14 {dimension_numbers = #tpu.dot_dimension_numbers<[1], [0], [0], [1], [0, 0, 1, 1], [], []>} : vector<8x128xbf16>, vector<128x128xbf16>, vector<8x128xf32> -> vector<8x128xf32>
    %c0_15 = arith.constant 0 : index
    %c0_16 = arith.constant 0 : index
    %19 = vector.load %arg7[%c0_15, %c0_16] : memref<1x128xf32, #tpu.memory_space<vmem>>, vector<1x128xf32>
    %20 = vector.broadcast %19 : vector<1x128xf32> to vector<8x128xf32>
    %21 = arith.addf %18, %20 : vector<8x128xf32>
    %cst_17 = arith.constant 0.000000e+00 : f32
    %22 = vector.broadcast %cst_17 : f32 to vector<8x128xf32>
    %23 = arith.maximumf %21, %22 : vector<8x128xf32>
    %c0_18 = arith.constant 0 : index
    %c0_19 = arith.constant 0 : index
    %24 = vector.load %arg8[%c0_18, %c0_19] : memref<8x128xf32, #tpu.memory_space<vmem>>, vector<8x128xf32>
    tpu.vector_store %arg8[%c0_18, %c0_19], %23 {strides = array<i32>} : memref<8x128xf32, #tpu.memory_space<vmem>>, vector<8x128xf32>,
    return
  }
  func.func @transform_0(%arg0: i32) -> (i32, i32) {
    %c0_i32 = arith.constant 0 : i32
    %c0_i32_0 = arith.constant 0 : i32
    return %arg0, %c0_i32 : i32, i32
  }
  func.func @transform_1(%arg0: i32) -> (i32, i32) {
    %c0_i32 = arith.constant 0 : i32
    %c0_i32_0 = arith.constant 0 : i32
    %c0_i32_1 = arith.constant 0 : i32
    return %c0_i32, %c0_i32_0 : i32, i32
  }
  func.func @transform_2(%arg0: i32) -> (i32, i32) {
    %c0_i32 = arith.constant 0 : i32
    %c0_i32_0 = arith.constant 0 : i32
    %c0_i32_1 = arith.constant 0 : i32
    return %c0_i32, %c0_i32_0 : i32, i32
  }
  func.func @transform_3(%arg0: i32) -> (i32, i32) {
    %c0_i32 = arith.constant 0 : i32
    %c0_i32_0 = arith.constant 0 : i32
    %c0_i32_1 = arith.constant 0 : i32
    return %c0_i32, %c0_i32_0 : i32, i32
  }
  func.func @transform_4(%arg0: i32) -> (i32, i32) {
    %c0_i32 = arith.constant 0 : i32
    %c0_i32_0 = arith.constant 0 : i32
    %c0_i32_1 = arith.constant 0 : i32
    return %c0_i32, %c0_i32_0 : i32, i32
  }
  func.func @transform_5(%arg0: i32) -> (i32, i32) {
    %c0_i32 = arith.constant 0 : i32
    %c0_i32_0 = arith.constant 0 : i32
    %c0_i32_1 = arith.constant 0 : i32
    return %c0_i32, %c0_i32_0 : i32, i32
  }
  func.func @transform_6(%arg0: i32) -> (i32, i32) {
    %c0_i32 = arith.constant 0 : i32
    %c0_i32_0 = arith.constant 0 : i32
    %c0_i32_1 = arith.constant 0 : i32
    return %c0_i32, %c0_i32_0 : i32, i32
  }
  func.func @transform_7(%arg0: i32) -> (i32, i32) {
    %c0_i32 = arith.constant 0 : i32
    %c0_i32_0 = arith.constant 0 : i32
    return %arg0, %c0_i32 : i32, i32
  }
}

</mosaic_0001>

<bundles_post_ra>
// kernel: tpu_custom_call.1
= control target key start
LH: loop header
LB: loop body
LE: loop exit
PB: predicated region body
PF: predicated region fallthrough
CT: control target
= control target key end

     0   :  { %12 = vsyncpa [#allocation3], 0  ;;  %s860_s0 = inlined_call_operand.hbm [shape: bf16[8,128], index: 0, kind: input, shape index: {}]   ;;  %s861_s1 = inlined_call_operand.hbm [shape: bf16[128,128], index: 1, kind: input, shape index: {}]   ;;  %s862_s2 = inlined_call_operand.vmem [shape: f32[1,128], index: 2, kind: input, shape index: {}]   ;;  %s863_s3 = inlined_call_operand.hbm [shape: bf16[128,128], index: 3, kind: input, shape index: {}]   ;;  %s864_s4 = inlined_call_operand.vmem [shape: f32[1,128], index: 4, kind: input, shape index: {}]   ;;  %s865_s5 = inlined_call_operand.hbm [shape: bf16[128,128], index: 5, kind: input, shape index: {}]   ;;  %s866_s6 = inlined_call_operand.vmem [shape: f32[1,128], index: 6, kind: input, shape index: {}]   ;;  %s867_s7 = inlined_call_operand.hbm [shape: f32[8,128], index: 7, kind: output, shape index: {}]  }
   0x1   :  { %13 = vsyncpa [#allocation6], 0 }
   0x2   :  { %14 = vsyncpa [#allocation9], 0 }
   0x3   :  { %15 = vsyncpa [#allocation4], 0  ;;  %s703_s24 = smov [#allocation5]   ;;  %s585_s28 = scalar_lea.hbm %s861_s1, 1024 }
   0x4   :  { %s31_s25 = sshll.u32 %s703_s24, 4  ;;  %p586_p0 = scmp.ne.s32.totalorder %s861_s1, %s585_s28  ;;  %s32_s25 = int_to_ptr.vmem [resolvable:$true] %s31_s25 }
   0x5   :  { %p589_p1 = scmp.lt.u32.totalorder %s585_s28, %s861_s1 }
   0x7   :  { %p591_p2 = pnand %p589_p1, %p586_p0 }
   0x9   :  { %594 = shalt.err (!%p591_p2)
}
   0xa   :  { %s595_s10 = scalar_lea.vmem %s32_s25, 1024  ;;  %p600_p4 = scmp.lt.s32.totalorder %s32_s25, %s32_s25 }
   0xb   :  { %p596_p3 = scmp.ne.s32.totalorder %s32_s25, %s595_s10  ;;  %p601_p5 = scmp.lt.s32.totalorder %s595_s10, %s595_s10 }
   0xd   :  { %p602_p6 = por %p601_p5, %p600_p4 }
   0xf   :  { %p603_p7 = pnand %p602_p6, %p596_p3 }
  0x11   :  { %606 = shalt.err (!%p603_p7)
}
  0x12   :  { %s704_s11 = smov 64   ;;  %s705_s12 = smov 4  }
  0x13   :  { %37 = dma.hbm_to_vmem [thread:$0]  %s861_s1, 1024, %s32_s25, [#allocation6], %s704_s11, %s704_s11, %s705_s12  }
  0x14   :  { %s706_s15 = smov [#allocation2]   ;;  %s707_s17 = smov [#allocation7]  }
  0x15   :  { %s22_s16 = sshll.u32 %s706_s15, 4  ;;  %s45_s18 = sshll.u32 %s707_s17, 4  ;;  %s23_s16 = int_to_ptr.vmem [resolvable:$true] %s22_s16  ;;  %s46_s18 = int_to_ptr.vmem [resolvable:$true] %s45_s18 }
  0x16   :  { %s607_s21 = scalar_lea.hbm %s860_s0, 64 }
  0x17   :  { %p608_p8 = scmp.ne.s32.totalorder %s860_s0, %s607_s21  ;;  %p611_p9 = scmp.lt.u32.totalorder %s607_s21, %s860_s0 }
  0x19   :  { %p613_p10 = pnand %p611_p9, %p608_p8 }
  0x1b   :  { %616 = shalt.err (!%p613_p10)
}
  0x1c   :  { %s617_s1 = scalar_lea.vmem %s23_s16, 64  ;;  %p622_p12 = scmp.lt.s32.totalorder %s23_s16, %s23_s16 }
  0x1d   :  { %p618_p11 = scmp.ne.s32.totalorder %s23_s16, %s617_s1  ;;  %p623_p13 = scmp.lt.s32.totalorder %s617_s1, %s617_s1 }
  0x1f   :  { %p624_p0 = por %p623_p13, %p622_p12 }
  0x21   :  { %p625_p1 = pnand %p624_p0, %p618_p11 }
  0x23   :  { %628 = shalt.err (!%p625_p1)
}
  0x24   :  { %25 = dma.hbm_to_vmem [thread:$0]  %s860_s0, 64, %s23_s16, [#allocation3]  }
  0x25   :  { %s629_s30 = scalar_lea.hbm %s863_s3, 1024 }
  0x26   :  { %p630_p2 = scmp.ne.s32.totalorder %s863_s3, %s629_s30  ;;  %p633_p3 = scmp.lt.u32.totalorder %s629_s30, %s863_s3 }
  0x28   :  { %p635_p4 = pnand %p633_p3, %p630_p2 }
  0x2a   :  { %638 = shalt.err (!%p635_p4)
}
  0x2b   :  { %s639_s14 = scalar_lea.vmem %s46_s18, 1024  ;;  %p644_p6 = scmp.lt.s32.totalorder %s46_s18, %s46_s18 }
  0x2c   :  { %p640_p5 = scmp.ne.s32.totalorder %s46_s18, %s639_s14  ;;  %p645_p7 = scmp.lt.s32.totalorder %s639_s14, %s639_s14 }
  0x2e   :  { %p646_p8 = por %p645_p7, %p644_p6 }
  0x30   :  { %p647_p9 = pnand %p646_p8, %p640_p5 }
  0x32   :  { %650 = shalt.err (!%p647_p9)
}
  0x33   :  { %51 = dma.hbm_to_vmem [thread:$0]  %s863_s3, 1024, %s46_s18, [#allocation6], %s704_s11, %s704_s11, %s705_s12  }
  0x34   :  { %s708_s16 = smov [#allocation8]   ;;  %s651_s21 = scalar_lea.hbm %s865_s5, 1024 }
  0x35   :  { %s59_s17 = sshll.u32 %s708_s16, 4  ;;  %p652_p10 = scmp.ne.s32.totalorder %s865_s5, %s651_s21  ;;  %s60_s17 = int_to_ptr.vmem [resolvable:$true] %s59_s17 }
  0x36   :  { %p655_p11 = scmp.lt.u32.totalorder %s651_s21, %s865_s5 }
  0x38   :  { %p657_p12 = pnand %p655_p11, %p652_p10 }
  0x3a   :  { %660 = shalt.err (!%p657_p12)
}
  0x3b   :  { %s661_s1 = scalar_lea.vmem %s60_s17, 1024  ;;  %p666_p0 = scmp.lt.s32.totalorder %s60_s17, %s60_s17 }
  0x3c   :  { %p662_p13 = scmp.ne.s32.totalorder %s60_s17, %s661_s1  ;;  %p667_p1 = scmp.lt.s32.totalorder %s661_s1, %s661_s1 }
  0x3e   :  { %p668_p2 = por %p667_p1, %p666_p0 }
  0x40   :  { %p669_p3 = pnand %p668_p2, %p662_p13 }
  0x42   :  { %672 = shalt.err (!%p669_p3)
}
  0x43   :  { %65 = dma.hbm_to_vmem [thread:$0]  %s865_s5, 1024, %s60_s17, [#allocation9], %s704_s11, %s704_s11, %s705_s12  }
  0x44   :  { %695 = dma.done.wait [#allocation3], 64  }
  0x45   :  { %696 = vsyncadd [#allocation3], 4294967232 }
  0x46   :  { %697 = dma.done.wait [#allocation6], 2048  }
  0x47   :  { %698 = vsyncadd [#allocation6], 4294965248 }
  0x48   :  { %699 = dma.done.wait [#allocation9], 1024  }
  0x49   :  { %700 = vsyncadd [#allocation9], 4294966272  ;;  %v709_v0 = vmov 0.0   ;;  %vm710_vm0 = vmmov 0   ;;  %v561_v1 = vld [vmem:[#allocation5] sm:$0xff]   ;;  %v562_v2 = vld [vmem:[#allocation5 + $0x8] sm:$0xff]  }
  0x4a   :  { %492 = vmatprep.subr.bf16.mxu0 %v709_v0  ;;  %508 = vmatprep.mubr.msk.bf16.mxu0 %vm710_vm0, %v709_v0  ;;  %v563_v3 = vld [vmem:[#allocation5 + $0x10] sm:$0xff]   ;;  %v569_v4 = vld [vmem:[#allocation7] sm:$0xff]   ;;  %v564_v5 = vld [vmem:[#allocation5 + $0x18] sm:$0xff]   ;;  %s711_s28 = smov [#allocation10]  }
  0x4b   :  { %512 = vmatprep.subr.bf16.mxu1 %v709_v0  ;;  %528 = vmatprep.mubr.msk.bf16.mxu1 %vm710_vm0, %v709_v0  ;;  %v570_v6 = vld [vmem:[#allocation7 + $0x8] sm:$0xff]   ;;  %v565_v7 = vld [vmem:[#allocation5 + $0x20] sm:$0xff]   ;;  %v571_v8 = vld [vmem:[#allocation7 + $0x10] sm:$0xff]   ;;  %s427_s29 = sshll.u32 %s711_s28, 4  ;;  %s428_s29 = int_to_ptr.vmem [resolvable:$true] %s427_s29 }
  0x4c   :  { %493 = vmatpush3.bf16.msra.mxu0 %v561_v1  ;;  %513 = vmatpush3.bf16.msra.mxu1 %v569_v4  ;;  %v566_v9 = vld [vmem:[#allocation5 + $0x28] sm:$0xff]   ;;  %v572_v10 = vld [vmem:[#allocation7 + $0x18] sm:$0xff]   ;;  %v567_v11 = vld [vmem:[#allocation5 + $0x30] sm:$0xff]   ;;  %p678_p5 = scmp.lt.s32.totalorder %s428_s29, %s428_s29 }
  0x4d   :  { %494 = vmatprep.subr.bf16.mxu0 %v709_v0  ;;  %514 = vmatprep.subr.bf16.mxu1 %v709_v0  ;;  %v573_v12 = vld [vmem:[#allocation7 + $0x20] sm:$0xff]   ;;  %v568_v13 = vld [vmem:[#allocation5 + $0x38] sm:$0xff]   ;;  %v574_v14 = vld [vmem:[#allocation7 + $0x28] sm:$0xff]  }
  0x4e   :  { %v81_v15 = vld [vmem:[#allocation2] sm:$0xf]  ;;  %v575_v16 = vld [vmem:[#allocation7 + $0x30] sm:$0xff]   ;;  %v577_v18 = vld [vmem:[#allocation8] sm:$0xff]  }
  0x4f   :  { %v576_v17 = vld [vmem:[#allocation7 + $0x38] sm:$0xff]   ;;  %v578_v19 = vld [vmem:[#allocation8 + $0x8] sm:$0xff]   ;;  %v579_v20 = vld [vmem:[#allocation8 + $0x10] sm:$0xff]  }
  0x50   :  { %495 = vmatpush3.bf16.msra.mxu0 %v562_v2  ;;  %515 = vmatpush3.bf16.msra.mxu1 %v570_v6  ;;  %v580_v21 = vld [vmem:[#allocation8 + $0x18] sm:$0xff]   ;;  %v581_v22 = vld [vmem:[#allocation8 + $0x20] sm:$0xff]   ;;  %v582_v23 = vld [vmem:[#allocation8 + $0x28] sm:$0xff]  }
  0x51   :  { %496 = vmatprep.subr.bf16.mxu0 %v709_v0  ;;  %516 = vmatprep.subr.bf16.mxu1 %v709_v0  ;;  %v438_v24 = vld [vmem:[%s862_s2] ss:$0 sm:$0xff]  ;;  %v583_v32 = vld [vmem:[#allocation8 + $0x30] sm:$0xff]  }
  0x52   :  { %v584_v33 = vld [vmem:[#allocation8 + $0x38] sm:$0xff]  }
  0x53   :  { %v447_v34 = vld [vmem:[%s864_s4] ss:$0 sm:$0xff]  ;;  %s673_s4 = scalar_lea.vmem %s428_s29, 128 }
  0x54   :  { %497 = vmatpush3.bf16.msra.mxu0 %v563_v3  ;;  %517 = vmatpush3.bf16.msra.mxu1 %v571_v8  ;;  %v456_v42 = vld [vmem:[%s866_s6] ss:$0 sm:$0xff]  ;;  %p674_p4 = scmp.ne.s32.totalorder %s428_s29, %s673_s4  ;;  %p679_p6 = scmp.lt.s32.totalorder %s673_s4, %s673_s4 }
  0x55   :  { %498 = vmatprep.subr.bf16.mxu0 %v709_v0  ;;  %518 = vmatprep.subr.bf16.mxu1 %v709_v0 }
  0x56   :  { %p680_p7 = por %p679_p6, %p678_p5 }
  0x58   :  { %499 = vmatpush3.bf16.msra.mxu0 %v564_v5  ;;  %519 = vmatpush3.bf16.msra.mxu1 %v572_v10  ;;  %p681_p8 = pnand %p680_p7, %p674_p4 }
  0x59   :  { %500 = vmatprep.subr.bf16.mxu0 %v709_v0  ;;  %520 = vmatprep.subr.bf16.mxu1 %v709_v0 }
  0x5c   :  { %501 = vmatpush3.bf16.msra.mxu0 %v565_v7  ;;  %521 = vmatpush3.bf16.msra.mxu1 %v573_v12 }
  0x5d   :  { %502 = vmatprep.subr.bf16.mxu0 %v709_v0  ;;  %522 = vmatprep.subr.bf16.mxu1 %v709_v0 }
  0x60   :  { %503 = vmatpush3.bf16.msra.mxu0 %v566_v9  ;;  %523 = vmatpush3.bf16.msra.mxu1 %v574_v14 }
  0x61   :  { %504 = vmatprep.subr.bf16.mxu0 %v709_v0  ;;  %524 = vmatprep.subr.bf16.mxu1 %v709_v0 }
  0x64   :  { %505 = vmatpush3.bf16.msra.mxu0 %v567_v11  ;;  %525 = vmatpush3.bf16.msra.mxu1 %v575_v16 }
  0x65   :  { %506 = vmatprep.subr.bf16.mxu0 %v709_v0  ;;  %526 = vmatprep.subr.bf16.mxu1 %v709_v0 }
  0x68   :  { %507 = vmatpush3.bf16.msra.mxu0 %v568_v13  ;;  %527 = vmatpush3.bf16.msra.mxu1 %v576_v17 }
  0x69   :  { %532 = vmatprep.subr.bf16.mxu0 %v709_v0 }
  0x6b   :  { %509 = vmatmul.mubr.bf16.vlgmr.msra.gmra.mrb[0].mxu0 %v81_v15 }
  0x6c   :  { %548 = vmatprep.mubr.msk.bf16.mxu0 %vm710_vm0, %v709_v0  ;;  %533 = vmatpush3.bf16.msra.mxu0 %v577_v18 }
  0x6d   :  { %534 = vmatprep.subr.bf16.mxu0 %v709_v0 }
  0x70   :  { %535 = vmatpush3.bf16.msra.mxu0 %v578_v19 }
  0x71   :  { %536 = vmatprep.subr.bf16.mxu0 %v709_v0 }
  0x74   :  { %537 = vmatpush3.bf16.msra.mxu0 %v579_v20 }
  0x75   :  { %538 = vmatprep.subr.bf16.mxu0 %v709_v0 }
  0x78   :  { %539 = vmatpush3.bf16.msra.mxu0 %v580_v21 }
  0x79   :  { %540 = vmatprep.subr.bf16.mxu0 %v709_v0 }
  0x7c   :  { %541 = vmatpush3.bf16.msra.mxu0 %v581_v22 }
  0x7d   :  { %542 = vmatprep.subr.bf16.mxu0 %v709_v0 }
  0x80   :  { %543 = vmatpush3.bf16.msra.mxu0 %v582_v23 }
  0x81   :  { %544 = vmatprep.subr.bf16.mxu0 %v709_v0 }
  0x84   :  { %545 = vmatpush3.bf16.msra.mxu0 %v583_v32 }
  0x85   :  { %546 = vmatprep.subr.bf16.mxu0 %v709_v0 }
  0x88   :  { %547 = vmatpush3.bf16.msra.mxu0 %v584_v33 }
 0x13e   :  { %v187_v25 = vpop.f32.mrb[0].mxu0 }
 0x13f   :  { %v188_v26 = vadd.f32 %v438_v24, %v187_v25  ;;  %v510_v27 = vpop.f32.mrb[1].mxu0 }
 0x140   :  { %v190_v28 = vpop.f32.mrb[2].mxu0 }
 0x141   :  { %v193_v29 = vmax.f32 %v188_v26, 0.0  ;;  %v511_v30 = vpop.f32.mrb[3].mxu0 }
 0x143   :  { %v194_v31 = vpack.c.bf16 %v193_v29, %v193_v29 }
 0x145   :  { %529 = vmatmul.mubr.bf16.vlgmr.msra.gmra.mrb[0].mxu1 %v194_v31 }
 0x218   :  { %v300_v35 = vpop.f32.mrb[0].mxu1 }
 0x219   :  { %v301_v36 = vadd.f32 %v447_v34, %v300_v35  ;;  %v530_v37 = vpop.f32.mrb[1].mxu1 }
 0x21a   :  { %v303_v38 = vpop.f32.mrb[2].mxu1 }
 0x21b   :  { %v306_v39 = vmax.f32 %v301_v36, 0.0  ;;  %v531_v40 = vpop.f32.mrb[3].mxu1 }
 0x21d   :  { %v307_v41 = vpack.c.bf16 %v306_v39, %v306_v39 }
 0x21f   :  { %549 = vmatmul.mubr.bf16.vlgmr.msra.gmra.mrb[4].mxu0 %v307_v41 }
 0x2f2   :  { %v413_v43 = vpop.f32.mrb[4].mxu0 }
 0x2f3   :  { %v414_v44 = vadd.f32 %v456_v42, %v413_v43  ;;  %v550_v45 = vpop.f32.mrb[5].mxu0 }
 0x2f4   :  { %v416_v46 = vpop.f32.mrb[6].mxu0 }
 0x2f5   :  { %v419_v47 = vmax.f32 %v414_v44, 0.0  ;;  %v551_v48 = vpop.f32.mrb[7].mxu0 }
 0x2f7   :  { %420 = vst [vmem:[#allocation10] sm:$0xff] %v419_v47 }
 0x2f8   :  { %684 = shalt.err (!%p681_p8)
}
 0x2f9   :  { %s685_s6 = scalar_lea.hbm %s867_s7, 128 }
 0x2fa   :  { %p686_p9 = scmp.ne.s32.totalorder %s867_s7, %s685_s6  ;;  %p689_p10 = scmp.lt.u32.totalorder %s685_s6, %s867_s7 }
 0x2fc   :  { %p691_p11 = pnand %p689_p10, %p686_p9 }
 0x2fe   :  { %694 = shalt.err (!%p691_p11)
}
 0x2ff   :  { %430 = dma.vmem_to_hbm [thread:$0]  %s428_s29, 128, %s867_s7, [#allocation4]  }
 0x300   :  { %701 = dma.done.wait [#allocation4], 128  }
 0x301   :  { %702 = vsyncadd [#allocation4], 4294967168 }
 0x302   :  { %434 = vsyncpa [#allocation3], 1 }
 0x303   :  { %435 = vsyncpa [#allocation6], 1 }
 0x304   :  { %436 = vsyncpa [#allocation9], 1 }
 0x305   :  { %437 = vsyncpa [#allocation4], 1 }

// kernel: tpu_custom_call.1
= control target key start
LH: loop header
LB: loop body
LE: loop exit
PB: predicated region body
PF: predicated region fallthrough
CT: control target
= control target key end

     0   :  { %12 = vsyncpa [#allocation3], 0  ;;  %s860_s0 = inlined_call_operand.hbm [shape: bf16[8,128], index: 0, kind: input, shape index: {}]   ;;  %s861_s1 = inlined_call_operand.hbm [shape: bf16[128,128], index: 1, kind: input, shape index: {}]   ;;  %s862_s2 = inlined_call_operand.vmem [shape: f32[1,128], index: 2, kind: input, shape index: {}]   ;;  %s863_s3 = inlined_call_operand.hbm [shape: bf16[128,128], index: 3, kind: input, shape index: {}]   ;;  %s864_s4 = inlined_call_operand.vmem [shape: f32[1,128], index: 4, kind: input, shape index: {}]   ;;  %s865_s5 = inlined_call_operand.hbm [shape: bf16[128,128], index: 5, kind: input, shape index: {}]   ;;  %s866_s6 = inlined_call_operand.vmem [shape: f32[1,128], index: 6, kind: input, shape index: {}]   ;;  %s867_s7 = inlined_call_operand.hbm [shape: f32[8,128], index: 7, kind: output, shape index: {}]  }
   0x1   :  { %13 = vsyncpa [#allocation6], 0 }
   0x2   :  { %14 = vsyncpa [#allocation9], 0 }
   0x3   :  { %15 = vsyncpa [#allocation4], 0  ;;  %s703_s24 = smov [#allocation5]   ;;  %s585_s28 = scalar_lea.hbm %s861_s1, 1024 }
   0x4   :  { %s31_s25 = sshll.u32 %s703_s24, 4  ;;  %p586_p0 = scmp.ne.s32.totalorder %s861_s1, %s585_s28  ;;  %s32_s25 = int_to_ptr.vmem [resolvable:$true] %s31_s25 }
   0x5   :  { %p589_p1 = scmp.lt.u32.totalorder %s585_s28, %s861_s1 }
   0x7   :  { %p591_p2 = pnand %p589_p1, %p586_p0 }
   0x9   :  { %594 = shalt.err (!%p591_p2)
}
   0xa   :  { %s595_s10 = scalar_lea.vmem %s32_s25, 1024  ;;  %p600_p4 = scmp.lt.s32.totalorder %s32_s25, %s32_s25 }
   0xb   :  { %p596_p3 = scmp.ne.s32.totalorder %s32_s25, %s595_s10  ;;  %p601_p5 = scmp.lt.s32.totalorder %s595_s10, %s595_s10 }
   0xd   :  { %p602_p6 = por %p601_p5, %p600_p4 }
   0xf   :  { %p603_p7 = pnand %p602_p6, %p596_p3 }
  0x11   :  { %606 = shalt.err (!%p603_p7)
}
  0x12   :  { %s704_s11 = smov 64   ;;  %s705_s12 = smov 4  }
  0x13   :  { %37 = dma.hbm_to_vmem [thread:$0]  %s861_s1, 1024, %s32_s25, [#allocation6], %s704_s11, %s704_s11, %s705_s12  }
  0x14   :  { %s706_s15 = smov [#allocation2]   ;;  %s707_s17 = smov [#allocation7]  }
  0x15   :  { %s22_s16 = sshll.u32 %s706_s15, 4  ;;  %s45_s18 = sshll.u32 %s707_s17, 4  ;;  %s23_s16 = int_to_ptr.vmem [resolvable:$true] %s22_s16  ;;  %s46_s18 = int_to_ptr.vmem [resolvable:$true] %s45_s18 }
  0x16   :  { %s607_s21 = scalar_lea.hbm %s860_s0, 64 }
  0x17   :  { %p608_p8 = scmp.ne.s32.totalorder %s860_s0, %s607_s21  ;;  %p611_p9 = scmp.lt.u32.totalorder %s607_s21, %s860_s0 }
  0x19   :  { %p613_p10 = pnand %p611_p9, %p608_p8 }
  0x1b   :  { %616 = shalt.err (!%p613_p10)
}
  0x1c   :  { %s617_s1 = scalar_lea.vmem %s23_s16, 64  ;;  %p622_p12 = scmp.lt.s32.totalorder %s23_s16, %s23_s16 }
  0x1d   :  { %p618_p11 = scmp.ne.s32.totalorder %s23_s16, %s617_s1  ;;  %p623_p13 = scmp.lt.s32.totalorder %s617_s1, %s617_s1 }
  0x1f   :  { %p624_p0 = por %p623_p13, %p622_p12 }
  0x21   :  { %p625_p1 = pnand %p624_p0, %p618_p11 }
  0x23   :  { %628 = shalt.err (!%p625_p1)
}
  0x24   :  { %25 = dma.hbm_to_vmem [thread:$0]  %s860_s0, 64, %s23_s16, [#allocation3]  }
  0x25   :  { %s629_s30 = scalar_lea.hbm %s863_s3, 1024 }
  0x26   :  { %p630_p2 = scmp.ne.s32.totalorder %s863_s3, %s629_s30  ;;  %p633_p3 = scmp.lt.u32.totalorder %s629_s30, %s863_s3 }
  0x28   :  { %p635_p4 = pnand %p633_p3, %p630_p2 }
  0x2a   :  { %638 = shalt.err (!%p635_p4)
}
  0x2b   :  { %s639_s14 = scalar_lea.vmem %s46_s18, 1024  ;;  %p644_p6 = scmp.lt.s32.totalorder %s46_s18, %s46_s18 }
  0x2c   :  { %p640_p5 = scmp.ne.s32.totalorder %s46_s18, %s639_s14  ;;  %p645_p7 = scmp.lt.s32.totalorder %s639_s14, %s639_s14 }
  0x2e   :  { %p646_p8 = por %p645_p7, %p644_p6 }
  0x30   :  { %p647_p9 = pnand %p646_p8, %p640_p5 }
  0x32   :  { %650 = shalt.err (!%p647_p9)
}
  0x33   :  { %51 = dma.hbm_to_vmem [thread:$0]  %s863_s3, 1024, %s46_s18, [#allocation6], %s704_s11, %s704_s11, %s705_s12  }
  0x34   :  { %s708_s16 = smov [#allocation8]   ;;  %s651_s21 = scalar_lea.hbm %s865_s5, 1024 }
  0x35   :  { %s59_s17 = sshll.u32 %s708_s16, 4  ;;  %p652_p10 = scmp.ne.s32.totalorder %s865_s5, %s651_s21  ;;  %s60_s17 = int_to_ptr.vmem [resolvable:$true] %s59_s17 }
  0x36   :  { %p655_p11 = scmp.lt.u32.totalorder %s651_s21, %s865_s5 }
  0x38   :  { %p657_p12 = pnand %p655_p11, %p652_p10 }
  0x3a   :  { %660 = shalt.err (!%p657_p12)
}
  0x3b   :  { %s661_s1 = scalar_lea.vmem %s60_s17, 1024  ;;  %p666_p0 = scmp.lt.s32.totalorder %s60_s17, %s60_s17 }
  0x3c   :  { %p662_p13 = scmp.ne.s32.totalorder %s60_s17, %s661_s1  ;;  %p667_p1 = scmp.lt.s32.totalorder %s661_s1, %s661_s1 }
  0x3e   :  { %p668_p2 = por %p667_p1, %p666_p0 }
  0x40   :  { %p669_p3 = pnand %p668_p2, %p662_p13 }
  0x42   :  { %672 = shalt.err (!%p669_p3)
}
  0x43   :  { %65 = dma.hbm_to_vmem [thread:$0]  %s865_s5, 1024, %s60_s17, [#allocation9], %s704_s11, %s704_s11, %s705_s12  }
  0x44   :  { %695 = dma.done.wait [#allocation3], 64  }
  0x45   :  { %696 = vsyncadd [#allocation3], 4294967232 }
  0x46   :  { %697 = dma.done.wait [#allocation6], 2048  }
  0x47   :  { %698 = vsyncadd [#allocation6], 4294965248 }
  0x48   :  { %699 = dma.done.wait [#allocation9], 1024  }
  0x49   :  { %700 = vsyncadd [#allocation9], 4294966272  ;;  %v709_v0 = vmov 0.0   ;;  %vm710_vm0 = vmmov 0   ;;  %v561_v1 = vld [vmem:[#allocation5] sm:$0xff]   ;;  %v562_v2 = vld [vmem:[#allocation5 + $0x8] sm:$0xff]  }
  0x4a   :  { %492 = vmatprep.subr.bf16.mxu0 %v709_v0  ;;  %508 = vmatprep.mubr.msk.bf16.mxu0 %vm710_vm0, %v709_v0  ;;  %v563_v3 = vld [vmem:[#allocation5 + $0x10] sm:$0xff]   ;;  %v569_v4 = vld [vmem:[#allocation7] sm:$0xff]   ;;  %v564_v5 = vld [vmem:[#allocation5 + $0x18] sm:$0xff]   ;;  %s711_s28 = smov [#allocation10]  }
  0x4b   :  { %512 = vmatprep.subr.bf16.mxu1 %v709_v0  ;;  %528 = vmatprep.mubr.msk.bf16.mxu1 %vm710_vm0, %v709_v0  ;;  %v570_v6 = vld [vmem:[#allocation7 + $0x8] sm:$0xff]   ;;  %v565_v7 = vld [vmem:[#allocation5 + $0x20] sm:$0xff]   ;;  %v571_v8 = vld [vmem:[#allocation7 + $0x10] sm:$0xff]   ;;  %s427_s29 = sshll.u32 %s711_s28, 4  ;;  %s428_s29 = int_to_ptr.vmem [resolvable:$true] %s427_s29 }
  0x4c   :  { %493 = vmatpush3.bf16.msra.mxu0 %v561_v1  ;;  %513 = vmatpush3.bf16.msra.mxu1 %v569_v4  ;;  %v566_v9 = vld [vmem:[#allocation5 + $0x28] sm:$0xff]   ;;  %v572_v10 = vld [vmem:[#allocation7 + $0x18] sm:$0xff]   ;;  %v567_v11 = vld [vmem:[#allocation5 + $0x30] sm:$0xff]   ;;  %p678_p5 = scmp.lt.s32.totalorder %s428_s29, %s428_s29 }
  0x4d   :  { %494 = vmatprep.subr.bf16.mxu0 %v709_v0  ;;  %514 = vmatprep.subr.bf16.mxu1 %v709_v0  ;;  %v573_v12 = vld [vmem:[#allocation7 + $0x20] sm:$0xff]   ;;  %v568_v13 = vld [vmem:[#allocation5 + $0x38] sm:$0xff]   ;;  %v574_v14 = vld [vmem:[#allocation7 + $0x28] sm:$0xff]  }
  0x4e   :  { %v81_v15 = vld [vmem:[#allocation2] sm:$0xf]  ;;  %v575_v16 = vld [vmem:[#allocation7 + $0x30] sm:$0xff]   ;;  %v577_v18 = vld [vmem:[#allocation8] sm:$0xff]  }
  0x4f   :  { %v576_v17 = vld [vmem:[#allocation7 + $0x38] sm:$0xff]   ;;  %v578_v19 = vld [vmem:[#allocation8 + $0x8] sm:$0xff]   ;;  %v579_v20 = vld [vmem:[#allocation8 + $0x10] sm:$0xff]  }
  0x50   :  { %495 = vmatpush3.bf16.msra.mxu0 %v562_v2  ;;  %515 = vmatpush3.bf16.msra.mxu1 %v570_v6  ;;  %v580_v21 = vld [vmem:[#allocation8 + $0x18] sm:$0xff]   ;;  %v581_v22 = vld [vmem:[#allocation8 + $0x20] sm:$0xff]   ;;  %v582_v23 = vld [vmem:[#allocation8 + $0x28] sm:$0xff]  }
  0x51   :  { %496 = vmatprep.subr.bf16.mxu0 %v709_v0  ;;  %516 = vmatprep.subr.bf16.mxu1 %v709_v0  ;;  %v438_v24 = vld [vmem:[%s862_s2] ss:$0 sm:$0xff]  ;;  %v583_v32 = vld [vmem:[#allocation8 + $0x30] sm:$0xff]  }
  0x52   :  { %v584_v33 = vld [vmem:[#allocation8 + $0x38] sm:$0xff]  }
  0x53   :  { %v447_v34 = vld [vmem:[%s864_s4] ss:$0 sm:$0xff]  ;;  %s673_s4 = scalar_lea.vmem %s428_s29, 128 }
  0x54   :  { %497 = vmatpush3.bf16.msra.mxu0 %v563_v3  ;;  %517 = vmatpush3.bf16.msra.mxu1 %v571_v8  ;;  %v456_v42 = vld [vmem:[%s866_s6] ss:$0 sm:$0xff]  ;;  %p674_p4 = scmp.ne.s32.totalorder %s428_s29, %s673_s4  ;;  %p679_p6 = scmp.lt.s32.totalorder %s673_s4, %s673_s4 }
  0x55   :  { %498 = vmatprep.subr.bf16.mxu0 %v709_v0  ;;  %518 = vmatprep.subr.bf16.mxu1 %v709_v0 }
  0x56   :  { %p680_p7 = por %p679_p6, %p678_p5 }
  0x58   :  { %499 = vmatpush3.bf16.msra.mxu0 %v564_v5  ;;  %519 = vmatpush3.bf16.msra.mxu1 %v572_v10  ;;  %p681_p8 = pnand %p680_p7, %p674_p4 }
  0x59   :  { %500 = vmatprep.subr.bf16.mxu0 %v709_v0  ;;  %520 = vmatprep.subr.bf16.mxu1 %v709_v0 }
  0x5c   :  { %501 = vmatpush3.bf16.msra.mxu0 %v565_v7  ;;  %521 = vmatpush3.bf16.msra.mxu1 %v573_v12 }
  0x5d   :  { %502 = vmatprep.subr.bf16.mxu0 %v709_v0  ;;  %522 = vmatprep.subr.bf16.mxu1 %v709_v0 }
  0x60   :  { %503 = vmatpush3.bf16.msra.mxu0 %v566_v9  ;;  %523 = vmatpush3.bf16.msra.mxu1 %v574_v14 }
  0x61   :  { %504 = vmatprep.subr.bf16.mxu0 %v709_v0  ;;  %524 = vmatprep.subr.bf16.mxu1 %v709_v0 }
  0x64   :  { %505 = vmatpush3.bf16.msra.mxu0 %v567_v11  ;;  %525 = vmatpush3.bf16.msra.mxu1 %v575_v16 }
  0x65   :  { %506 = vmatprep.subr.bf16.mxu0 %v709_v0  ;;  %526 = vmatprep.subr.bf16.mxu1 %v709_v0 }
  0x68   :  { %507 = vmatpush3.bf16.msra.mxu0 %v568_v13  ;;  %527 = vmatpush3.bf16.msra.mxu1 %v576_v17 }
  0x69   :  { %532 = vmatprep.subr.bf16.mxu0 %v709_v0 }
  0x6b   :  { %509 = vmatmul.mubr.bf16.vlgmr.msra.gmra.mrb[0].mxu0 %v81_v15 }
  0x6c   :  { %548 = vmatprep.mubr.msk.bf16.mxu0 %vm710_vm0, %v709_v0  ;;  %533 = vmatpush3.bf16.msra.mxu0 %v577_v18 }
  0x6d   :  { %534 = vmatprep.subr.bf16.mxu0 %v709_v0 }
  0x70   :  { %535 = vmatpush3.bf16.msra.mxu0 %v578_v19 }
  0x71   :  { %536 = vmatprep.subr.bf16.mxu0 %v709_v0 }
  0x74   :  { %537 = vmatpush3.bf16.msra.mxu0 %v579_v20 }
  0x75   :  { %538 = vmatprep.subr.bf16.mxu0 %v709_v0 }
  0x78   :  { %539 = vmatpush3.bf16.msra.mxu0 %v580_v21 }
  0x79   :  { %540 = vmatprep.subr.bf16.mxu0 %v709_v0 }
  0x7c   :  { %541 = vmatpush3.bf16.msra.mxu0 %v581_v22 }
  0x7d   :  { %542 = vmatprep.subr.bf16.mxu0 %v709_v0 }
  0x80   :  { %543 = vmatpush3.bf16.msra.mxu0 %v582_v23 }
  0x81   :  { %544 = vmatprep.subr.bf16.mxu0 %v709_v0 }
  0x84   :  { %545 = vmatpush3.bf16.msra.mxu0 %v583_v32 }
  0x85   :  { %546 = vmatprep.subr.bf16.mxu0 %v709_v0 }
  0x88   :  { %547 = vmatpush3.bf16.msra.mxu0 %v584_v33 }
 0x13e   :  { %v187_v25 = vpop.f32.mrb[0].mxu0 }
 0x13f   :  { %v188_v26 = vadd.f32 %v438_v24, %v187_v25  ;;  %v510_v27 = vpop.f32.mrb[1].mxu0 }
 0x140   :  { %v190_v28 = vpop.f32.mrb[2].mxu0 }
 0x141   :  { %v193_v29 = vmax.f32 %v188_v26, 0.0  ;;  %v511_v30 = vpop.f32.mrb[3].mxu0 }
 0x143   :  { %v194_v31 = vpack.c.bf16 %v193_v29, %v193_v29 }
 0x145   :  { %529 = vmatmul.mubr.bf16.vlgmr.msra.gmra.mrb[0].mxu1 %v194_v31 }
 0x218   :  { %v300_v35 = vpop.f32.mrb[0].mxu1 }
 0x219   :  { %v301_v36 = vadd.f32 %v447_v34, %v300_v35  ;;  %v530_v37 = vpop.f32.mrb[1].mxu1 }
 0x21a   :  { %v303_v38 = vpop.f32.mrb[2].mxu1 }
 0x21b   :  { %v306_v39 = vmax.f32 %v301_v36, 0.0  ;;  %v531_v40 = vpop.f32.mrb[3].mxu1 }
 0x21d   :  { %v307_v41 = vpack.c.bf16 %v306_v39, %v306_v39 }
 0x21f   :  { %549 = vmatmul.mubr.bf16.vlgmr.msra.gmra.mrb[4].mxu0 %v307_v41 }
 0x2f2   :  { %v413_v43 = vpop.f32.mrb[4].mxu0 }
 0x2f3   :  { %v414_v44 = vadd.f32 %v456_v42, %v413_v43  ;;  %v550_v45 = vpop.f32.mrb[5].mxu0 }
 0x2f4   :  { %v416_v46 = vpop.f32.mrb[6].mxu0 }
 0x2f5   :  { %v419_v47 = vmax.f32 %v414_v44, 0.0  ;;  %v551_v48 = vpop.f32.mrb[7].mxu0 }
 0x2f7   :  { %420 = vst [vmem:[#allocation10] sm:$0xff] %v419_v47 }
 0x2f8   :  { %684 = shalt.err (!%p681_p8)
}
 0x2f9   :  { %s685_s6 = scalar_lea.hbm %s867_s7, 128 }
 0x2fa   :  { %p686_p9 = scmp.ne.s32.totalorder %s867_s7, %s685_s6  ;;  %p689_p10 = scmp.lt.u32.totalorder %s685_s6, %s867_s7 }
 0x2fc   :  { %p691_p11 = pnand %p689_p10, %p686_p9 }
 0x2fe   :  { %694 = shalt.err (!%p691_p11)
}
 0x2ff   :  { %430 = dma.vmem_to_hbm [thread:$0]  %s428_s29, 128, %s867_s7, [#allocation4]  }
 0x300   :  { %701 = dma.done.wait [#allocation4], 128  }
 0x301   :  { %702 = vsyncadd [#allocation4], 4294967168 }
 0x302   :  { %434 = vsyncpa [#allocation3], 1 }
 0x303   :  { %435 = vsyncpa [#allocation6], 1 }
 0x304   :  { %436 = vsyncpa [#allocation9], 1 }
 0x305   :  { %437 = vsyncpa [#allocation4], 1 }

</bundles_post_ra>
